<compile_context>
chip_gen: v7x
topology: tpu7x:2x2x1
jax: 0.10.0
libtpu: 0.0.40
codegen_flags: <defaults>
</compile_context>

<pallas_src>
import jax
import jax.numpy as jnp
from jax.experimental import pallas as pl
from jax.experimental.pallas import tpu as pltpu

LANE = 128


def _cdiv(a, b):
    return -(-a // b)


def _round_up(x, m):
    return _cdiv(x, m) * m


def epitope_conv_kernel(wt_ref, patch_ref, out_ref):
    # out^T = W_eff^T @ X_patch ; bias is folded into the all-ones patch row,
    # so the whole forward pass is one small-K MXU matmul plus an EUP tanh.
    out_ref[...] = jnp.tanh(
        jnp.dot(wt_ref[...], patch_ref[...],
                preferred_element_type=jnp.float32))


def epitope_conv(x, w1, b1, w2, b2):
    """x: (B, L) float32 (PyTorch input before unsqueeze(1)).
    w1: (H,1,3), b1: (H,), w2: (H,H,3), b2: (H,) in PyTorch Conv1d layout.
    Returns (B, H, P2) matching the PyTorch module output."""
    B, L = x.shape
    H = w1.shape[0]
    L1 = L - 2
    P1 = L1 // 2
    L3 = P1 - 2
    P2 = L3 // 2
    assert P2 >= 1, "sequence too short for EpitopeConv"

    f32 = jnp.float32
    KP = 16                      # 10 real taps + 5 zero pads + 1 bias row
    HS = _round_up(H, 8)         # hidden dim on sublanes (no 128-lane padding)

    # ---- compose both conv+pool stages into a single 10-tap stride-4 conv ---
    # Stage 1 (conv k=3 + avgpool 2) as 4 taps over x:
    w1m = w1[:, 0, :].astype(f32)                                  # (H, 3)
    g1 = jnp.stack([0.5 * w1m[:, 0],
                    0.5 * (w1m[:, 0] + w1m[:, 1]),
                    0.5 * (w1m[:, 1] + w1m[:, 2]),
                    0.5 * w1m[:, 2]], axis=0)                      # (4, C)  [n, c]
    # Stage 2 (conv k=3 + avgpool 2) as 4 taps over p1:
    w2m = jnp.transpose(w2, (2, 1, 0)).astype(f32)                 # (3, C, H)
    g2 = jnp.stack([0.5 * w2m[0],
                    0.5 * (w2m[0] + w2m[1]),
                    0.5 * (w2m[1] + w2m[2]),
                    0.5 * w2m[2]], axis=0)                         # (4, C, H) [m, c, h]
    # Composition: tau = 2m + n in [0, 10)
    a_mnh = jnp.einsum('mch,nc->mnh', g2, g1)                      # (4, 4, H)
    w_eff = jnp.zeros((10, H), f32)
    for m in range(4):
        w_eff = w_eff.at[2 * m:2 * m + 4, :].add(a_mnh[m])
    b_eff = b2.astype(f32) + jnp.einsum('mch,c->h', g2, b1.astype(f32))

    wt = jnp.zeros((HS, KP), f32)
    wt = wt.at[:H, :10].set(w_eff.T)
    wt = wt.at[:H, KP - 1].set(b_eff)                              # bias tap

    # ---- host-side im2col: reshape + unit-stride slices only (no gather) ----
    # chunks[b, i, r] = x[b, 4i + r]  ->  x[b, 4j + tau] = chunks[b, j + tau//4, tau%4]
    Lw = 4 * (P2 + 3)
    x32 = x.astype(f32)
    if Lw > L:
        x32 = jnp.pad(x32, ((0, 0), (0, Lw - L)))
    chunks = x32[:, :Lw].reshape(B, P2 + 3, 4)
    Mtot = B * P2
    rows = []
    for tau in range(10):
        q, r = divmod(tau, 4)
        rows.append(chunks[:, q:q + P2, r].reshape(Mtot))
    rows += [jnp.zeros((Mtot,), f32)] * (KP - 11)
    rows.append(jnp.ones((Mtot,), f32))                            # bias row
    patch = jnp.stack(rows, axis=0)                                # (KP, B*P2)

    # ---- lane blocking: lane-padded VMEM accounting, >=2 steps when possible
    per_lane_bytes = 4 * (2 * KP + 3 * HS)   # dbl-buf patch + dbl-buf out + matmul temp
    budget = 8 << 20
    mb_cap = max(LANE, (budget // per_lane_bytes) // LANE * LANE)
    M_min = _round_up(Mtot, LANE)
    n_steps = _cdiv(M_min, mb_cap)
    if M_min >= 2 * LANE:
        n_steps = max(n_steps, 2)            # let both v7x TensorCores work
    MB = _round_up(_cdiv(M_min, n_steps), LANE)
    n_steps = _cdiv(M_min, MB)
    M_pad = n_steps * MB

    patch = jnp.pad(patch, ((0, 0), (0, M_pad - Mtot)))

    vmem_need = 4 * MB * (2 * KP + 3 * HS) + 8 * HS * LANE + (1 << 20)
    vmem_limit = int(min(32 << 20, max(16 << 20, 2 * vmem_need)))

    out_t = pl.pallas_call(
        epitope_conv_kernel,
        out_shape=jax.ShapeDtypeStruct((HS, M_pad), f32),
        grid_spec=pltpu.PrefetchScalarGridSpec(
            num_scalar_prefetch=0,
            grid=(n_steps,),
            in_specs=[
                pl.BlockSpec((HS, KP), lambda i: (0, 0)),   # composed weights (+bias)
                pl.BlockSpec((KP, MB), lambda i: (0, i)),   # patch columns
            ],
            out_specs=pl.BlockSpec((HS, MB), lambda i: (0, i)),
        ),
        compiler_params=pltpu.CompilerParams(
            dimension_semantics=("parallel",),
            vmem_limit_bytes=vmem_limit),
    )(wt, patch)

    # (HS, M_pad) -> (B, H, P2): slice off padding, back to PyTorch NCW layout.
    out = out_t[:H, :Mtot].reshape(H, B, P2)
    return jnp.transpose(out, (1, 0, 2))


def epitope_conv_ref(x, w1, b1, w2, b2):
    """Pure-JAX reference with identical semantics (for correctness check)."""
    B, L = x.shape
    H = w1.shape[0]
    L1 = L - 2
    patches = jnp.stack([x[:, k:k + L1] for k in range(3)], axis=-1)       # (B,L1,3)
    c1 = jnp.einsum('blk,hk->bhl', patches, w1[:, 0, :]) + b1[None, :, None]
    P1 = L1 // 2
    p1 = c1[:, :, :2 * P1].reshape(B, H, P1, 2).mean(-1)
    L3 = P1 - 2
    patches2 = jnp.stack([p1[:, :, k:k + L3] for k in range(3)], axis=-1)  # (B,H,L3,3)
    c2 = jnp.einsum('bclk,hck->bhl', patches2, w2) + b2[None, :, None]
    P2 = L3 // 2
    return jnp.tanh(c2[:, :, :2 * P2].reshape(B, H, P2, 2).mean(-1))


if __name__ == "__main__":
    B = 2          # batch
    L = 64         # seq_length (unirep output dim, small for test)
    H = 32         # embed_size / hidden_size

    key = jax.random.PRNGKey(0)
    k1, k2, k3, k4, k5 = jax.random.split(key, 5)

    # Deterministic init mimicking PyTorch Conv1d default (uniform +/- 1/sqrt(fan_in)).
    bound1 = 1.0 / (1 * 3) ** 0.5
    w1 = jax.random.uniform(k1, (H, 1, 3), jnp.float32, -bound1, bound1)
    b1 = jax.random.uniform(k2, (H,), jnp.float32, -bound1, bound1)
    bound2 = 1.0 / (H * 3) ** 0.5
    w2 = jax.random.uniform(k3, (H, H, 3), jnp.float32, -bound2, bound2)
    b2 = jax.random.uniform(k4, (H,), jnp.float32, -bound2, bound2)

    x = jax.random.normal(k5, (B, L), jnp.float32)

    out = epitope_conv(x, w1, b1, w2, b2)
    out = jax.block_until_ready(out)

    ref = jax.block_until_ready(epitope_conv_ref(x, w1, b1, w2, b2))
    P2 = ((L - 2) // 2 - 2) // 2
    assert out.shape == ref.shape == (B, H, P2), out.shape
    assert jnp.allclose(out, ref, atol=1e-4, rtol=1e-4), \
        float(jnp.max(jnp.abs(out - ref)))

    print("KERNEL_OK")
</pallas_src>

<mosaic_0001>
module attributes {stable_mosaic.version = 11 : i64} {
  func.func @epitope_conv_kernel(%arg0: i32, %arg1: memref<32x16xf32, #tpu.memory_space<vmem>>, %arg2: memref<16x128xf32, #tpu.memory_space<vmem>>, %arg3: memref<32x128xf32, #tpu.memory_space<vmem>>) attributes {dimension_semantics = [#tpu.dimension_semantics<parallel>], iteration_bounds = array<i64: 1>, scalar_prefetch = 0 : i64, scratch_operands = 0 : i64, tpu.core_type = #tpu.core_type<tc>, window_params = [{pipeline_mode = #tpu.pipeline_mode<synchronous>, transform_indices = @transform_0, window_bounds = array<i64: 32, 16>}, {transform_indices = @transform_1, window_bounds = array<i64: 16, 128>}, {transform_indices = @transform_2, window_bounds = array<i64: 32, 128>}]} {
    %c0 = arith.constant 0 : index
    %c0_0 = arith.constant 0 : index
    %0 = vector.load %arg1[%c0, %c0_0] : memref<32x16xf32, #tpu.memory_space<vmem>>, vector<32x16xf32>
    %c0_1 = arith.constant 0 : index
    %c0_2 = arith.constant 0 : index
    %1 = vector.load %arg2[%c0_1, %c0_2] : memref<16x128xf32, #tpu.memory_space<vmem>>, vector<16x128xf32>
    %cst = arith.constant dense<0.000000e+00> : vector<32x128xf32>
    %2 = tpu.matmul %0, %1, %cst {dimension_numbers = #tpu.dot_dimension_numbers<[1], [0], [0], [1], [0, 0, 1, 1], [], []>} : vector<32x16xf32>, vector<16x128xf32>, vector<32x128xf32> -> vector<32x128xf32>
    %3 = math.tanh %2 : vector<32x128xf32>
    %c0_3 = arith.constant 0 : index
    %c0_4 = arith.constant 0 : index
    %4 = vector.load %arg3[%c0_3, %c0_4] : memref<32x128xf32, #tpu.memory_space<vmem>>, vector<32x128xf32>
    tpu.vector_store %arg3[%c0_3, %c0_4], %3 {strides = array<i32>} : memref<32x128xf32, #tpu.memory_space<vmem>>, vector<32x128xf32>,
    return
  }
  func.func @transform_0(%arg0: i32) -> (i32, i32) {
    %c0_i32 = arith.constant 0 : i32
    %c0_i32_0 = arith.constant 0 : i32
    %c0_i32_1 = arith.constant 0 : i32
    return %c0_i32, %c0_i32_0 : i32, i32
  }
  func.func @transform_1(%arg0: i32) -> (i32, i32) {
    %c0_i32 = arith.constant 0 : i32
    %c0_i32_0 = arith.constant 0 : i32
    return %c0_i32, %arg0 : i32, i32
  }
  func.func @transform_2(%arg0: i32) -> (i32, i32) {
    %c0_i32 = arith.constant 0 : i32
    %c0_i32_0 = arith.constant 0 : i32
    return %c0_i32, %arg0 : i32, i32
  }
}

</mosaic_0001>

<bundles_post_ra>
// kernel: tpu_custom_call.1
= control target key start
LH: loop header
LB: loop body
LE: loop exit
PB: predicated region body
PF: predicated region fallthrough
CT: control target
= control target key end

     0   :  { %vm18_vm0 = vcmask 130048   ;;  %s249_s0 = inlined_call_operand.vmem [shape: f32[32,16], index: 0, kind: input, shape index: {}]   ;;  %s250_s1 = inlined_call_operand.vmem [shape: f32[16,128], index: 1, kind: input, shape index: {}]   ;;  %s251_s2 = inlined_call_operand.hbm [shape: f32[32,128], index: 2, kind: output, shape index: {}]  }
   0x1   :  { %v16_v0 = vld [vmem:[%s250_s1] sm:$0xff]  ;;  %v17_v1 = vld [vmem:[%s250_s1 + $0x8] sm:$0xff]  ;;  %v14_v4 = vld [vmem:[%s249_s0 + $0x10] sm:$0xff] }
   0x2   :  { %v12_v2 = vld [vmem:[%s249_s0] sm:$0xff]  ;;  %v160_v3 = vpack.c.bf16 %v17_v1, %v16_v0  ;;  %157 = vmatprep.mubr.msk.f32.mxu1 %vm18_vm0, %v14_v4 }
   0x3   :  { %154 = vmatprep.mubr.msk.f32.mxu0 %vm18_vm0, %v12_v2 }
   0x4   :  { %7 = vsyncpa [#allocation3], 0  ;;  %161 = vmatprep.subr.bf16.mxu0 %v160_v3  ;;  %164 = vmatprep.subr.bf16.mxu1 %v160_v3  ;;  %v13_v5 = vld [vmem:[%s249_s0 + $0x8] sm:$0xff]  ;;  %v15_v6 = vld [vmem:[%s249_s0 + $0x18] sm:$0xff]  ;;  %s201_s20 = smov [#allocation2]  }
   0x5   :  { %163 = vmatpush3.bf16.msra.mxu0 %v160_v3  ;;  %165 = vmatpush3.bf16.msra.mxu1 %v160_v3  ;;  %s129_s21 = sshll.u32 %s201_s20, 4  ;;  %s130_s21 = int_to_ptr.vmem [resolvable:$true] %s129_s21 }
   0x6   :  { %s177_s0 = scalar_lea.vmem %s130_s21, 512  ;;  %p182_p1 = scmp.lt.s32.totalorder %s130_s21, %s130_s21 }
   0x7   :  { %p178_p0 = scmp.ne.s32.totalorder %s130_s21, %s177_s0  ;;  %p183_p2 = scmp.lt.s32.totalorder %s177_s0, %s177_s0 }
   0x8   :  { %155 = vmatmul.mubr.msk.f32.vlgmr.msra.gmra.mrb[0].mxu0 %vm18_vm0, %v13_v5  ;;  %158 = vmatmul.mubr.msk.f32.vlgmr.msra.gmra.mrb[0].mxu1 %vm18_vm0, %v15_v6 }
   0x9   :  { %p184_p3 = por %p183_p2, %p182_p1 }
   0xb   :  { %p185_p4 = pnand %p184_p3, %p178_p0 }
  0xdb   :  { %v156_v7 = vpop.f32.mrb[0].mxu0  ;;  %v159_v8 = vpop.f32.mrb[0].mxu1 }
  0xdc   :  { %169 = vtanh.f32 %v156_v7  ;;  %v97_v9 = vpop.f32.mrb[1].mxu0  ;;  %v107_v10 = vpop.f32.mrb[1].mxu1 }
  0xdd   :  { %171 = vtanh.f32 %v159_v8 }
  0xde   :  { %173 = vtanh.f32 %v97_v9 }
  0xdf   :  { %175 = vtanh.f32 %v107_v10 }
  0xe6   :  { %v170_v11 = vpop.eup %169 }
  0xe7   :  { %v172_v12 = vpop.eup %171  ;;  %121 = vst [vmem:[#allocation2 + $0x8] sm:$0xff] %v170_v11 }
  0xe8   :  { %v174_v13 = vpop.eup %173  ;;  %123 = vst [vmem:[#allocation2 + $0x18] sm:$0xff] %v172_v12 }
  0xe9   :  { %v176_v14 = vpop.eup %175  ;;  %120 = vst [vmem:[#allocation2] sm:$0xff] %v174_v13 }
  0xea   :  { %122 = vst [vmem:[#allocation2 + $0x10] sm:$0xff] %v176_v14 }
  0xeb   :  { %188 = shalt.err (!%p185_p4)
}
  0xec   :  { %s189_s24 = scalar_lea.hbm %s251_s2, 512 }
  0xed   :  { %p190_p5 = scmp.ne.s32.totalorder %s251_s2, %s189_s24  ;;  %p193_p6 = scmp.lt.u32.totalorder %s189_s24, %s251_s2 }
  0xef   :  { %p195_p7 = pnand %p193_p6, %p190_p5 }
  0xf1   :  { %198 = shalt.err (!%p195_p7)
}
  0xf2   :  { %s202_s29 = smov 128   ;;  %s203_s30 = smov 8  }
  0xf3   :  { %135 = dma.vmem_to_hbm [thread:$0]  %s130_s21, 512, %s251_s2, [#allocation3], %s202_s29, %s202_s29, %s203_s30  }
  0xf4   :  { %199 = dma.done.wait [#allocation3], 512  }
  0xf5   :  { %200 = vsyncadd [#allocation3], 4294966784 }
  0xf6   :  { %139 = vsyncpa [#allocation3], 1 }

</bundles_post_ra>
